<compile_context>
chip_gen: v7x
topology: tpu7x:2x2x1
jax: 0.10.0
libtpu: 0.0.40
codegen_flags: <defaults>
</compile_context>

<pallas_src>
import jax
import jax.numpy as jnp
from jax.experimental import pallas as pl
from jax.experimental.pallas import tpu as pltpu


def _pos_embed_kernel(col_ref, row_ref, out_ref):
    # col_ref: (W, D)      full column-embedding table (x_emb)
    # row_ref: (H, D)      full row-embedding table    (y_emb)
    # out_ref: (H, W, 2D)  pos[h, w] = concat(x_emb[w], y_emb[h])
    H, W, D2 = out_ref.shape
    D = D2 // 2
    col = col_ref[...]  # (W, D)
    row = row_ref[...]  # (H, D)
    # First half of the feature dim: x_emb[w], broadcast over the h axis.
    out_ref[:, :, :D] = jnp.broadcast_to(col[None, :, :], (H, W, D))
    # Second half: y_emb[h], broadcast over the w (sublane) axis.
    out_ref[:, :, D:] = jnp.broadcast_to(row[:, None, :], (H, W, D))


def position_embedding_learned(row_weight: jax.Array, col_weight: jax.Array) -> jax.Array:
    """row_weight: [H, D], col_weight: [W, D] -> pos: [H*W, 2D] (matches torch .flatten(0,1))."""
    H, D = row_weight.shape
    W, Dc = col_weight.shape
    assert D == Dc

    pos_3d = pl.pallas_call(
        _pos_embed_kernel,
        out_shape=jax.ShapeDtypeStruct((H, W, 2 * D), row_weight.dtype),
        # Single invocation, whole arrays resident in VMEM (total ~68 KB).
        in_specs=[
            pl.BlockSpec(memory_space=pltpu.MemorySpace.VMEM),  # col table (W, D)
            pl.BlockSpec(memory_space=pltpu.MemorySpace.VMEM),  # row table (H, D)
        ],
        out_specs=pl.BlockSpec(memory_space=pltpu.MemorySpace.VMEM),
    )(col_weight, row_weight)

    # Free, contiguous row-major reshape: (H, W, 2D) -> (H*W, 2D).
    return pos_3d.reshape(H * W, 2 * D)


if __name__ == "__main__":
    # feature_size = (H, W) = (16, 16), num_pos_feats = 32
    H, W, D = 16, 16, 32
    key = jax.random.PRNGKey(0)
    k_row, k_col, k_x = jax.random.split(key, 3)

    # nn.init.uniform_ -> uniform(0, 1), deterministic here via PRNGKey(0)
    row_weight = jax.random.uniform(k_row, (H, D), dtype=jnp.float32)
    col_weight = jax.random.uniform(k_col, (W, D), dtype=jnp.float32)

    # Input tensor (unused by the math, just like in the PyTorch forward —
    # it only supplies the device there).
    x = jax.random.normal(k_x, (2, 4, H, W), dtype=jnp.float32)
    del x

    pos = position_embedding_learned(row_weight, col_weight)
    pos = jax.block_until_ready(pos)

    # Reference check in plain JAX (mirrors the PyTorch forward exactly).
    x_emb = col_weight                                    # [W, D]
    y_emb = row_weight                                    # [H, D]
    ref = jnp.concatenate(
        [jnp.broadcast_to(x_emb[None, :, :], (H, W, D)),
         jnp.broadcast_to(y_emb[:, None, :], (H, W, D))],
        axis=-1,
    ).reshape(H * W, 2 * D)

    assert pos.shape == (H * W, 2 * D)
    assert jnp.allclose(pos, ref, atol=0, rtol=0)
    print("KERNEL_OK")
</pallas_src>

<mosaic_0001>
module attributes {stable_mosaic.version = 11 : i64} {
  func.func @_pos_embed_kernel(%arg0: memref<16x32xf32, #tpu.memory_space<vmem>>, %arg1: memref<16x32xf32, #tpu.memory_space<vmem>>, %arg2: memref<16x16x64xf32, #tpu.memory_space<vmem>>) attributes {dimension_semantics = [], scalar_prefetch = 0 : i64, scratch_operands = 0 : i64, tpu.core_type = #tpu.core_type<tc>} {
    %c0 = arith.constant 0 : index
    %c0_0 = arith.constant 0 : index
    %0 = vector.load %arg0[%c0, %c0_0] : memref<16x32xf32, #tpu.memory_space<vmem>>, vector<16x32xf32>
    %c0_1 = arith.constant 0 : index
    %c0_2 = arith.constant 0 : index
    %1 = vector.load %arg1[%c0_1, %c0_2] : memref<16x32xf32, #tpu.memory_space<vmem>>, vector<16x32xf32>
    %2 = vector.shape_cast %0 : vector<16x32xf32> to vector<1x16x32xf32>
    %3 = vector.shape_cast %2 : vector<1x16x32xf32> to vector<1x16x32xf32>
    %4 = vector.broadcast %3 : vector<1x16x32xf32> to vector<16x16x32xf32>
    %c0_3 = arith.constant 0 : index
    %c0_4 = arith.constant 0 : index
    %c0_5 = arith.constant 0 : index
    %5 = vector.load %arg2[%c0_3, %c0_4, %c0_5] : memref<16x16x64xf32, #tpu.memory_space<vmem>>, vector<16x16x32xf32>
    tpu.vector_store %arg2[%c0_3, %c0_4, %c0_5], %4 {strides = array<i32>} : memref<16x16x64xf32, #tpu.memory_space<vmem>>, vector<16x16x32xf32>,
    %6 = vector.shape_cast %1 : vector<16x32xf32> to vector<16x1x32xf32>
    %7 = vector.shape_cast %6 : vector<16x1x32xf32> to vector<16x1x32xf32>
    %8 = vector.broadcast %7 : vector<16x1x32xf32> to vector<16x16x32xf32>
    %c0_6 = arith.constant 0 : index
    %c0_7 = arith.constant 0 : index
    %c32 = arith.constant 32 : index
    %9 = vector.load %arg2[%c0_6, %c0_7, %c32] : memref<16x16x64xf32, #tpu.memory_space<vmem>>, vector<16x16x32xf32>
    tpu.vector_store %arg2[%c0_6, %c0_7, %c32], %8 {strides = array<i32>} : memref<16x16x64xf32, #tpu.memory_space<vmem>>, vector<16x16x32xf32>,
    return
  }
}

</mosaic_0001>

<bundles_post_ra>
// kernel: tpu_custom_call.1
= control target key start
LH: loop header
LB: loop body
LE: loop exit
PB: predicated region body
PF: predicated region fallthrough
CT: control target
= control target key end

     0   :  { %7 = vsyncpa [#allocation3], 0  ;;  %s605_s0 = inlined_call_operand.hbm [shape: f32[16,32], index: 0, kind: input, shape index: {}]   ;;  %s606_s1 = inlined_call_operand.hbm [shape: f32[16,32], index: 1, kind: input, shape index: {}]   ;;  %s607_s2 = inlined_call_operand.hbm [shape: f32[16,16,64], index: 2, kind: output, shape index: {}]  }
   0x1   :  { %8 = vsyncpa [#allocation6], 0 }
   0x2   :  { %9 = vsyncpa [#allocation4], 0  ;;  %s421_s9 = smov [#allocation2]   ;;  %s349_s13 = scalar_lea.hbm %s605_s0, 256 }
   0x3   :  { %s15_s10 = sshll.u32 %s421_s9, 4  ;;  %p350_p0 = scmp.ne.s32.totalorder %s605_s0, %s349_s13  ;;  %s16_s10 = int_to_ptr.vmem [resolvable:$true] %s15_s10 }
   0x4   :  { %p353_p1 = scmp.lt.u32.totalorder %s349_s13, %s605_s0 }
   0x6   :  { %p355_p2 = pnand %p353_p1, %p350_p0 }
   0x8   :  { %358 = shalt.err (!%p355_p2)
}
   0x9   :  { %s359_s18 = scalar_lea.vmem %s16_s10, 256  ;;  %p364_p4 = scmp.lt.s32.totalorder %s16_s10, %s16_s10 }
   0xa   :  { %p360_p3 = scmp.ne.s32.totalorder %s16_s10, %s359_s18  ;;  %p365_p5 = scmp.lt.s32.totalorder %s359_s18, %s359_s18 }
   0xc   :  { %p366_p6 = por %p365_p5, %p364_p4 }
   0xe   :  { %p367_p7 = pnand %p366_p6, %p360_p3 }
  0x10   :  { %370 = shalt.err (!%p367_p7)
}
  0x11   :  { %s422_s19 = smov 128   ;;  %s423_s20 = smov 8  }
  0x12   :  { %21 = dma.hbm_to_vmem [thread:$0]  %s605_s0, 256, %s16_s10, [#allocation3], %s422_s19, %s422_s19, %s423_s20  }
  0x13   :  { %s424_s23 = smov [#allocation5]   ;;  %s371_s27 = scalar_lea.hbm %s606_s1, 256 }
  0x14   :  { %s27_s24 = sshll.u32 %s424_s23, 4  ;;  %p372_p8 = scmp.ne.s32.totalorder %s606_s1, %s371_s27  ;;  %s28_s24 = int_to_ptr.vmem [resolvable:$true] %s27_s24 }
  0x15   :  { %p375_p9 = scmp.lt.u32.totalorder %s371_s27, %s606_s1 }
  0x17   :  { %p377_p10 = pnand %p375_p9, %p372_p8 }
  0x19   :  { %380 = shalt.err (!%p377_p10)
}
  0x1a   :  { %s381_s4 = scalar_lea.vmem %s28_s24, 256  ;;  %p386_p12 = scmp.lt.s32.totalorder %s28_s24, %s28_s24 }
  0x1b   :  { %p382_p11 = scmp.ne.s32.totalorder %s28_s24, %s381_s4  ;;  %p387_p13 = scmp.lt.s32.totalorder %s381_s4, %s381_s4 }
  0x1d   :  { %p388_p0 = por %p387_p13, %p386_p12 }
  0x1f   :  { %p389_p1 = pnand %p388_p0, %p382_p11 }
  0x21   :  { %392 = shalt.err (!%p389_p1)
}
  0x22   :  { %33 = dma.hbm_to_vmem [thread:$0]  %s606_s1, 256, %s28_s24, [#allocation6], %s422_s19, %s422_s19, %s423_s20  }
  0x23   :  { %415 = dma.done.wait [#allocation3], 256  }
  0x24   :  { %416 = vsyncadd [#allocation3], 4294967040 }
  0x25   :  { %417 = dma.done.wait [#allocation6], 256  }
  0x26   :  { %418 = vsyncadd [#allocation6], 4294967040  ;;  %v83_v0 = vlaneseq  ;;  %v425_v1 = vmov 1966171168   ;;  %vm44_vm0 = vcmask 261120   ;;  %v42_v6 = vld [vmem:[#allocation5] sm:$0xff] }
  0x27   :  { %v81_v2 = vunpack.c.l.s4 %v425_v1  ;;  %v475_v7 = vld [vmem:[#allocation5 + $0x8] sm:$0xff]  ;;  %v40_v8 = vld [vmem:[#allocation2] sm:$0xff]  ;;  %v79_v11 = vcombine.high %v42_v6, %v42_v6  ;;  %v41_v13 = vld [vmem:[#allocation2 + $0x8] sm:$0xff]  ;;  %s426_s1 = smov 32   ;;  %vm289_vm1 = vcmask 523520   ;;  %s427_s6 = smov [#allocation7]  }
  0x28   :  { %v84_v3 = vshrl.u32 %v83_v0, 7  ;;  %45 = vst.msk [vmem:[#allocation7] sm:$0xff] %vm44_vm0, %v40_v8  ;;  %47 = vst.msk [vmem:[#allocation7 + $0x10] sm:$0xff] %vm44_vm0, %v40_v8  ;;  %v128_v32 = vcombine.high %v475_v7, %v475_v7  ;;  %s327_s7 = sshll.u32 %s427_s6, 4  ;;  %s328_s7 = int_to_ptr.vmem [resolvable:$true] %s327_s7 }
  0x29   :  { %v82_v4 = vunpack.c.0.s8 %v81_v2  ;;  %49 = vst.msk [vmem:[#allocation7 + $0x20] sm:$0xff] %vm44_vm0, %v40_v8  ;;  %51 = vst.msk [vmem:[#allocation7 + $0x30] sm:$0xff] %vm44_vm0, %v40_v8  ;;  %s393_s8 = scalar_lea.vmem %s328_s7, 4096  ;;  %p398_p3 = scmp.lt.s32.totalorder %s328_s7, %s328_s7 }
  0x2a   :  { %v478_v10 = vsub.s32 0, %v84_v3  ;;  %53 = vst.msk [vmem:[#allocation7 + $0x40] sm:$0xff] %vm44_vm0, %v40_v8  ;;  %55 = vst.msk [vmem:[#allocation7 + $0x50] sm:$0xff] %vm44_vm0, %v40_v8  ;;  %p394_p2 = scmp.ne.s32.totalorder %s328_s7, %s393_s8  ;;  %p399_p4 = scmp.lt.s32.totalorder %s393_s8, %s393_s8 }
  0x2b   :  { %v473_v5 = vsub.s32 %v82_v4, %v84_v3  ;;  %57 = vst.msk [vmem:[#allocation7 + $0x60] sm:$0xff] %vm44_vm0, %v40_v8  ;;  %59 = vst.msk [vmem:[#allocation7 + $0x70] sm:$0xff] %vm44_vm0, %v40_v8 }
  0x2c   :  { %61 = vst.msk [vmem:[#allocation7 + $0x80] sm:$0xff] %vm44_vm0, %v40_v8  ;;  %63 = vst.msk [vmem:[#allocation7 + $0x90] sm:$0xff] %vm44_vm0, %v40_v8  ;;  %p400_p5 = por %p399_p4, %p398_p3 }
  0x2d   :  { %v86_v9 = vrot.slane %v42_v6, %v473_v5  ;;  %v135_v12 = vrot.slane %v475_v7, %v473_v5  ;;  %65 = vst.msk [vmem:[#allocation7 + $0xa0] sm:$0xff] %vm44_vm0, %v40_v8  ;;  %67 = vst.msk [vmem:[#allocation7 + $0xb0] sm:$0xff] %vm44_vm0, %v40_v8  ;;  %v93_v21 = vrot.slane %v79_v11, %v473_v5 }
  0x2e   :  { %69 = vst.msk [vmem:[#allocation7 + $0xc0] sm:$0xff] %vm44_vm0, %v40_v8  ;;  %71 = vst.msk [vmem:[#allocation7 + $0xd0] sm:$0xff] %vm44_vm0, %v40_v8  ;;  %v142_v37 = vrot.slane %v128_v32, %v473_v5  ;;  %p401_p6 = pnand %p400_p5, %p394_p2 }
  0x2f   :  { %73 = vst.msk [vmem:[#allocation7 + $0xe0] sm:$0xff] %vm44_vm0, %v40_v8  ;;  %75 = vst.msk [vmem:[#allocation7 + $0xf0] sm:$0xff] %vm44_vm0, %v40_v8  ;;  %v102_v14 = vrot.slane %v86_v9, %v473_v5  ;;  %v94_v15 = vcombine.high %v86_v9, %v86_v9  ;;  %v151_v16 = vrot.slane %v135_v12, %v473_v5 }
  0x30   :  { %46 = vst.msk [vmem:[#allocation7 + $0x8] sm:$0xff] %vm44_vm0, %v41_v13  ;;  %48 = vst.msk [vmem:[#allocation7 + $0x18] sm:$0xff] %vm44_vm0, %v41_v13  ;;  %v143_v17 = vcombine.high %v135_v12, %v135_v12  ;;  %v95_v27 = vcombine.high %v93_v21, %v93_v21  ;;  %v109_v29 = vrot.slane %v93_v21, %v473_v5 }
  0x31   :  { %50 = vst.msk [vmem:[#allocation7 + $0x28] sm:$0xff] %vm44_vm0, %v41_v13  ;;  %52 = vst.msk [vmem:[#allocation7 + $0x38] sm:$0xff] %vm44_vm0, %v41_v13  ;;  %v180_v18 = vrot.slane %v102_v14, %v478_v10  ;;  %v124_v19 = vcombine.high %v102_v14, %v102_v14  ;;  %v116_v22 = vrot.slane %v94_v15, %v473_v5 }
  0x32   :  { %54 = vst.msk [vmem:[#allocation7 + $0x48] sm:$0xff] %vm44_vm0, %v41_v13  ;;  %56 = vst.msk [vmem:[#allocation7 + $0x58] sm:$0xff] %vm44_vm0, %v41_v13  ;;  %v165_v20 = vrot.slane %v143_v17, %v473_v5  ;;  %v212_v24 = vrot.slane %v151_v16, %v478_v10  ;;  %v123_v31 = vrot.slane %v95_v27, %v473_v5 }
  0x33   :  { %58 = vst.msk [vmem:[#allocation7 + $0x68] sm:$0xff] %vm44_vm0, %v41_v13  ;;  %60 = vst.msk [vmem:[#allocation7 + $0x78] sm:$0xff] %vm44_vm0, %v41_v13  ;;  %241 = vrot.lane.b32.xlu0 %v180_v18, %s426_s1  ;;  %v188_v23 = vrot.slane %v124_v19, %v478_v10  ;;  %v126_v26 = vcombine.high %v116_v22, %v116_v22  ;;  %v184_v28 = vrot.slane %v116_v22, %v478_v10 }
  0x34   :  { %62 = vst.msk [vmem:[#allocation7 + $0x88] sm:$0xff] %vm44_vm0, %v41_v13  ;;  %64 = vst.msk [vmem:[#allocation7 + $0x98] sm:$0xff] %vm44_vm0, %v41_v13  ;;  %v216_v25 = vrot.slane %v165_v20, %v478_v10  ;;  %v196_v33 = vrot.slane %v109_v29, %v478_v10  ;;  %v125_v34 = vcombine.high %v109_v29, %v109_v29 }
  0x35   :  { %66 = vst.msk [vmem:[#allocation7 + $0xa8] sm:$0xff] %vm44_vm0, %v41_v13  ;;  %68 = vst.msk [vmem:[#allocation7 + $0xb8] sm:$0xff] %vm44_vm0, %v41_v13  ;;  %245 = vrot.lane.b32.xlu1 %v188_v23, %s426_s1  ;;  %v192_v30 = vrot.slane %v126_v26, %v478_v10  ;;  %v200_v35 = vrot.slane %v123_v31, %v478_v10  ;;  %v175_v36 = vcombine.high %v165_v20, %v165_v20 }
  0x36   :  { %70 = vst.msk [vmem:[#allocation7 + $0xc8] sm:$0xff] %vm44_vm0, %v41_v13  ;;  %72 = vst.msk [vmem:[#allocation7 + $0xd8] sm:$0xff] %vm44_vm0, %v41_v13  ;;  %v204_v38 = vrot.slane %v125_v34, %v478_v10  ;;  %v173_v39 = vcombine.high %v151_v16, %v151_v16  ;;  %v127_v41 = vcombine.high %v123_v31, %v123_v31 }
  0x37   :  { %74 = vst.msk [vmem:[#allocation7 + $0xe8] sm:$0xff] %vm44_vm0, %v41_v13  ;;  %76 = vst.msk [vmem:[#allocation7 + $0xf8] sm:$0xff] %vm44_vm0, %v41_v13  ;;  %257 = vrot.lane.b32.xlu0 %v212_v24, %s426_s1  ;;  %v224_v40 = vrot.slane %v175_v36, %v478_v10  ;;  %v144_v42 = vcombine.high %v142_v37, %v142_v37  ;;  %v158_v44 = vrot.slane %v142_v37, %v473_v5 }
  0x38   :  { %v220_v43 = vrot.slane %v173_v39, %v478_v10  ;;  %v208_v45 = vrot.slane %v127_v41, %v478_v10 }
  0x39   :  { %259 = vrot.lane.b32.xlu1 %v216_v25, %s426_s1  ;;  %v172_v46 = vrot.slane %v144_v42, %v473_v5  ;;  %v228_v47 = vrot.slane %v158_v44, %v478_v10  ;;  %v174_v48 = vcombine.high %v158_v44, %v158_v44 }
  0x3b   :  { %243 = vrot.lane.b32.xlu0 %v184_v28, %s426_s1  ;;  %v232_v49 = vrot.slane %v172_v46, %v478_v10  ;;  %v176_v50 = vcombine.high %v172_v46, %v172_v46  ;;  %v236_v51 = vrot.slane %v174_v48, %v478_v10 }
  0x3d   :  { %247 = vrot.lane.b32.xlu1 %v192_v30, %s426_s1  ;;  %v240_v52 = vrot.slane %v176_v50, %v478_v10 }
  0x3f   :  { %249 = vrot.lane.b32.xlu0 %v196_v33, %s426_s1 }
  0x41   :  { %251 = vrot.lane.b32.xlu1 %v200_v35, %s426_s1 }
  0x43   :  { %253 = vrot.lane.b32.xlu0 %v204_v38, %s426_s1 }
  0x45   :  { %263 = vrot.lane.b32.xlu1 %v224_v40, %s426_s1 }
  0x47   :  { %261 = vrot.lane.b32.xlu0 %v220_v43, %s426_s1 }
  0x49   :  { %255 = vrot.lane.b32.xlu1 %v208_v45, %s426_s1 }
  0x4b   :  { %265 = vrot.lane.b32.xlu0 %v228_v47, %s426_s1 }
  0x4d   :  { %267 = vrot.lane.b32.xlu1 %v232_v49, %s426_s1 }
  0x4f   :  { %269 = vrot.lane.b32.xlu0 %v236_v51, %s426_s1 }
  0x51   :  { %271 = vrot.lane.b32.xlu1 %v240_v52, %s426_s1 }
  0xa5   :  { %v242_v53 = vpop.permute.xlu0 %241 }
  0xa6   :  { %290 = vst.msk [vmem:[#allocation7] sm:$0xff] %vm289_vm1, %v242_v53  ;;  %291 = vst.msk [vmem:[#allocation7 + $0x8] sm:$0xff] %vm289_vm1, %v242_v53 }
  0xa7   :  { %v246_v54 = vpop.permute.xlu1 %245 }
  0xa8   :  { %294 = vst.msk [vmem:[#allocation7 + $0x20] sm:$0xff] %vm289_vm1, %v246_v54  ;;  %295 = vst.msk [vmem:[#allocation7 + $0x28] sm:$0xff] %vm289_vm1, %v246_v54 }
  0xa9   :  { %v258_v55 = vpop.permute.xlu0 %257 }
  0xaa   :  { %306 = vst.msk [vmem:[#allocation7 + $0x80] sm:$0xff] %vm289_vm1, %v258_v55  ;;  %307 = vst.msk [vmem:[#allocation7 + $0x88] sm:$0xff] %vm289_vm1, %v258_v55 }
  0xab   :  { %v260_v56 = vpop.permute.xlu1 %259 }
  0xac   :  { %308 = vst.msk [vmem:[#allocation7 + $0x90] sm:$0xff] %vm289_vm1, %v260_v56  ;;  %309 = vst.msk [vmem:[#allocation7 + $0x98] sm:$0xff] %vm289_vm1, %v260_v56 }
  0xad   :  { %v244_v57 = vpop.permute.xlu0 %243 }
  0xae   :  { %292 = vst.msk [vmem:[#allocation7 + $0x10] sm:$0xff] %vm289_vm1, %v244_v57  ;;  %293 = vst.msk [vmem:[#allocation7 + $0x18] sm:$0xff] %vm289_vm1, %v244_v57 }
  0xaf   :  { %v248_v58 = vpop.permute.xlu1 %247 }
  0xb0   :  { %296 = vst.msk [vmem:[#allocation7 + $0x30] sm:$0xff] %vm289_vm1, %v248_v58  ;;  %297 = vst.msk [vmem:[#allocation7 + $0x38] sm:$0xff] %vm289_vm1, %v248_v58 }
  0xb1   :  { %v250_v59 = vpop.permute.xlu0 %249 }
  0xb2   :  { %298 = vst.msk [vmem:[#allocation7 + $0x40] sm:$0xff] %vm289_vm1, %v250_v59  ;;  %299 = vst.msk [vmem:[#allocation7 + $0x48] sm:$0xff] %vm289_vm1, %v250_v59 }
  0xb3   :  { %v252_v60 = vpop.permute.xlu1 %251 }
  0xb4   :  { %300 = vst.msk [vmem:[#allocation7 + $0x50] sm:$0xff] %vm289_vm1, %v252_v60  ;;  %301 = vst.msk [vmem:[#allocation7 + $0x58] sm:$0xff] %vm289_vm1, %v252_v60 }
  0xb5   :  { %v254_v61 = vpop.permute.xlu0 %253 }
  0xb6   :  { %302 = vst.msk [vmem:[#allocation7 + $0x60] sm:$0xff] %vm289_vm1, %v254_v61  ;;  %303 = vst.msk [vmem:[#allocation7 + $0x68] sm:$0xff] %vm289_vm1, %v254_v61 }
  0xb7   :  { %v264_v62 = vpop.permute.xlu1 %263 }
  0xb8   :  { %312 = vst.msk [vmem:[#allocation7 + $0xb0] sm:$0xff] %vm289_vm1, %v264_v62  ;;  %313 = vst.msk [vmem:[#allocation7 + $0xb8] sm:$0xff] %vm289_vm1, %v264_v62 }
  0xb9   :  { %v262_v63 = vpop.permute.xlu0 %261 }
  0xba   :  { %310 = vst.msk [vmem:[#allocation7 + $0xa0] sm:$0xff] %vm289_vm1, %v262_v63  ;;  %311 = vst.msk [vmem:[#allocation7 + $0xa8] sm:$0xff] %vm289_vm1, %v262_v63 }
  0xbb   :  { %v256_v0 = vpop.permute.xlu1 %255 }
  0xbc   :  { %304 = vst.msk [vmem:[#allocation7 + $0x70] sm:$0xff] %vm289_vm1, %v256_v0  ;;  %305 = vst.msk [vmem:[#allocation7 + $0x78] sm:$0xff] %vm289_vm1, %v256_v0 }
  0xbd   :  { %v266_v1 = vpop.permute.xlu0 %265 }
  0xbe   :  { %314 = vst.msk [vmem:[#allocation7 + $0xc0] sm:$0xff] %vm289_vm1, %v266_v1  ;;  %315 = vst.msk [vmem:[#allocation7 + $0xc8] sm:$0xff] %vm289_vm1, %v266_v1 }
  0xbf   :  { %v268_v2 = vpop.permute.xlu1 %267 }
  0xc0   :  { %316 = vst.msk [vmem:[#allocation7 + $0xd0] sm:$0xff] %vm289_vm1, %v268_v2  ;;  %317 = vst.msk [vmem:[#allocation7 + $0xd8] sm:$0xff] %vm289_vm1, %v268_v2 }
  0xc1   :  { %v270_v3 = vpop.permute.xlu0 %269 }
  0xc2   :  { %318 = vst.msk [vmem:[#allocation7 + $0xe0] sm:$0xff] %vm289_vm1, %v270_v3  ;;  %319 = vst.msk [vmem:[#allocation7 + $0xe8] sm:$0xff] %vm289_vm1, %v270_v3 }
  0xc3   :  { %v272_v4 = vpop.permute.xlu1 %271 }
  0xc4   :  { %320 = vst.msk [vmem:[#allocation7 + $0xf0] sm:$0xff] %vm289_vm1, %v272_v4  ;;  %321 = vst.msk [vmem:[#allocation7 + $0xf8] sm:$0xff] %vm289_vm1, %v272_v4 }
  0xc5   :  { %404 = shalt.err (!%p401_p6)
}
  0xc6   :  { %s405_s11 = scalar_lea.hbm %s607_s2, 4096 }
  0xc7   :  { %p406_p7 = scmp.ne.s32.totalorder %s607_s2, %s405_s11  ;;  %p409_p8 = scmp.lt.u32.totalorder %s405_s11, %s607_s2 }
  0xc9   :  { %p411_p9 = pnand %p409_p8, %p406_p7 }
  0xcb   :  { %414 = shalt.err (!%p411_p9)
}
  0xcc   :  { %333 = dma.vmem_to_hbm [thread:$0]  %s328_s7, 4096, %s607_s2, [#allocation4], %s422_s19, %s422_s19, %s423_s20  }
  0xcd   :  { %419 = dma.done.wait [#allocation4], 4096  }
  0xce   :  { %420 = vsyncadd [#allocation4], 4294963200 }
  0xcf   :  { %337 = vsyncpa [#allocation3], 1 }
  0xd0   :  { %338 = vsyncpa [#allocation6], 1 }
  0xd1   :  { %339 = vsyncpa [#allocation4], 1 }

</bundles_post_ra>
